<compile_context>
chip_gen: v5e
topology: v5e:2x2
jax: 0.10.0
libtpu: 0.0.40
codegen_flags: <defaults>
</compile_context>

<pallas_src>
import functools

import jax
import jax.numpy as jnp
from jax.experimental import pallas as pl
from jax.experimental.pallas import tpu as pltpu

EPS = 1e-5
_MiB = 1024 * 1024
_WS_BUDGET = 24 * _MiB   # per-matmul VMEM working-set budget (safe on v5e/v6e/v7x)


# ------------------------------------------------------------------ helpers
def _round_up(x, m):
    return ((x + m - 1) // m) * m


def _pad2(a, mp, np_):
    m, n = a.shape
    if (m, n) == (mp, np_):
        return a
    return jnp.pad(a, ((0, mp - m), (0, np_ - n)))


def _to_nchw(x):
    return jnp.transpose(x.astype(jnp.float32), (0, 3, 1, 2))


def _lane_tiles(p, cap=2048):
    """Multiples of 128 dividing p (p is a multiple of 128), descending, <= cap."""
    q = p // 128
    return sorted({128 * d for d in range(1, q + 1) if q % d == 0 and 128 * d <= cap},
                  reverse=True)


def _ws_bytes(tm, tk, tn, has_res):
    b = 2 * tm * tk * 2            # A bf16, double-buffered
    b += 2 * tk * tn * 2           # B bf16, double-buffered
    b += 2 * tm * tn * 2           # bf16 output, double-buffered
    b += tm * tn * 4               # f32 accumulator scratch
    b += 2 * 8 * tn * 4            # bias (sublane-padded)
    if has_res:
        b += 2 * tm * tn * 2       # residual bf16, double-buffered
    return b


def _pick_tiles(M, K, N, has_res):
    Kp = _round_up(K, 128)
    Np = _round_up(N, 128)
    tm = 512 if M >= 512 else _round_up(M, 16)
    Mp = _round_up(M, tm)

    best = None
    for tn in _lane_tiles(Np):
        for tk in _lane_tiles(Kp):
            if _ws_bytes(tm, tk, tn, has_res) <= _WS_BUDGET:
                cand = (tn * tk, tn, tk)
                if best is None or cand > best:
                    best = cand
                break
    if best is None:
        tn, tk = 128, 128
    else:
        _, tn, tk = best

    # Guarantee >= 2 parallel (i, j) blocks so both TensorCores get work on
    # v7x; prefer splitting M (re-reads the usually smaller weight tile).
    if (Mp // tm) * (Np // tn) < 2:
        if tm % 32 == 0:
            tm //= 2
        elif Np // tn == 1 and tn % 256 == 0:
            tn //= 2
    return Mp, Kp, Np, tm, tk, tn


def _pick_rows(Rp, cap=1024):
    if Rp <= cap:
        return Rp
    for t in (1024, 512, 256, 128, 64, 32, 16):
        if Rp % t == 0:
            return t
    return 16


def _lane_dense(x, min_rows=16):
    """Flatten to a lane-dense [Rp, 128] slab (Rp multiple of 16 for bf16)."""
    t = x.size
    r = -(-t // 128)
    rp = _round_up(max(r, 1), min_rows)
    flat = jnp.pad(x.reshape(-1), (0, rp * 128 - t)).reshape(rp, 128)
    return flat, t, rp


# ------------------------------------------------------ Pallas matmul kernel
@functools.lru_cache(maxsize=None)
def _get_matmul(Mp, Kp, Np, tm, tk, tn, relu, has_res):
    """bf16 out = maybe_relu(A @ B + bias [+ residual]); f32 VMEM accumulation."""

    def kernel(*refs):
        if has_res:
            a_ref, b_ref, bias_ref, res_ref, o_ref, acc_ref = refs
        else:
            a_ref, b_ref, bias_ref, o_ref, acc_ref = refs
            res_ref = None
        k = pl.program_id(2)
        part = jnp.dot(a_ref[...], b_ref[...], preferred_element_type=jnp.float32)

        @pl.when(k == 0)
        def _():                      # no zero-init store + load
            acc_ref[...] = part

        @pl.when(k != 0)
        def _():
            acc_ref[...] += part

        @pl.when(k == pl.num_programs(2) - 1)
        def _():
            out = acc_ref[...] + bias_ref[...]
            if res_ref is not None:
                out = out + res_ref[...].astype(jnp.float32)
            if relu:
                out = jnp.maximum(out, 0.0)
            o_ref[...] = out.astype(o_ref.dtype)

    in_specs = [
        pl.BlockSpec((tm, tk), lambda i, j, k: (i, k)),
        pl.BlockSpec((tk, tn), lambda i, j, k: (k, j)),
        pl.BlockSpec((1, tn), lambda i, j, k: (0, j)),
    ]
    if has_res:
        in_specs.append(pl.BlockSpec((tm, tn), lambda i, j, k: (i, j)))

    ws = _ws_bytes(tm, tk, tn, has_res)
    vmem_limit = int(max(24 * _MiB, min(int(1.3 * ws) + 8 * _MiB, 44 * _MiB)))
    cost = pl.CostEstimate(
        flops=2 * Mp * Np * Kp,
        transcendentals=0,
        bytes_accessed=int(2 * (Mp * Kp + Kp * Np + Mp * Np * (2 if has_res else 1))
                           + 4 * Np))

    return pl.pallas_call(
        kernel,
        out_shape=jax.ShapeDtypeStruct((Mp, Np), jnp.bfloat16),
        grid_spec=pltpu.PrefetchScalarGridSpec(
            num_scalar_prefetch=0,
            grid=(Mp // tm, Np // tn, Kp // tk),
            in_specs=in_specs,
            out_specs=pl.BlockSpec((tm, tn), lambda i, j, k: (i, j)),
            scratch_shapes=[pltpu.VMEM((tm, tn), jnp.float32)]),
        compiler_params=pltpu.CompilerParams(
            dimension_semantics=("parallel", "parallel", "arbitrary"),
            vmem_limit_bytes=vmem_limit),
        cost_estimate=cost,
    )


def matmul_bias(a, b, bias, residual=None, relu=False):
    """maybe_relu(a @ b + bias [+ residual]) on the MXU, bf16 in / bf16 out."""
    M, K = a.shape
    _, N = b.shape
    has_res = residual is not None
    Mp, Kp, Np, tm, tk, tn = _pick_tiles(M, K, N, has_res)

    a_p = _pad2(a.astype(jnp.bfloat16), Mp, Kp)
    b_p = _pad2(b.astype(jnp.bfloat16), Kp, Np)
    bias_p = _pad2(bias.reshape(1, N).astype(jnp.float32), 1, Np)
    args = [a_p, b_p, bias_p]
    if has_res:
        args.append(_pad2(residual.astype(jnp.bfloat16), Mp, Np))

    out = _get_matmul(Mp, Kp, Np, tm, tk, tn, bool(relu), has_res)(*args)
    return out[:M, :N]


# ------------------------------------------------- Pallas elementwise kernels
@functools.lru_cache(maxsize=None)
def _get_bn_relu(Rp, tr):
    """Fused BN-affine + ReLU with two lane-dense [Rp, 128] bf16 outputs."""

    def kernel(x_ref, s_ref, b_ref, bn_ref, relu_ref):
        y = x_ref[...].astype(jnp.float32) * s_ref[...] + b_ref[...]
        bn_ref[...] = y.astype(bn_ref.dtype)
        relu_ref[...] = jnp.maximum(y, 0.0).astype(relu_ref.dtype)

    return pl.pallas_call(
        kernel,
        out_shape=(jax.ShapeDtypeStruct((Rp, 128), jnp.bfloat16),
                   jax.ShapeDtypeStruct((Rp, 128), jnp.bfloat16)),
        grid=(Rp // tr,),
        in_specs=[pl.BlockSpec((tr, 128), lambda i: (i, 0)),
                  pl.BlockSpec((1, 128), lambda i: (0, 0)),
                  pl.BlockSpec((1, 128), lambda i: (0, 0))],
        out_specs=(pl.BlockSpec((tr, 128), lambda i: (i, 0)),
                   pl.BlockSpec((tr, 128), lambda i: (i, 0))),
        compiler_params=pltpu.CompilerParams(
            dimension_semantics=("parallel",)),
    )


@functools.lru_cache(maxsize=None)
def _get_max3(Rp, tr):
    """Elementwise max of three lane-dense slabs (H-axis taps of the maxpool)."""

    def kernel(a_ref, b_ref, c_ref, o_ref):
        m = jnp.maximum(jnp.maximum(a_ref[...], b_ref[...]), c_ref[...])
        o_ref[...] = m.astype(o_ref.dtype)

    spec = pl.BlockSpec((tr, 128), lambda i: (i, 0))
    return pl.pallas_call(
        kernel,
        out_shape=jax.ShapeDtypeStruct((Rp, 128), jnp.bfloat16),
        grid=(Rp // tr,),
        in_specs=[spec, spec, spec],
        out_specs=spec,
        compiler_params=pltpu.CompilerParams(
            dimension_semantics=("parallel",)),
    )


@functools.lru_cache(maxsize=None)
def _get_spatial_mean(HW, NCp, tc):
    inv = 1.0 / float(HW)

    def kernel(x_ref, o_ref):
        o_ref[...] = jnp.sum(x_ref[...], axis=0, keepdims=True) * inv

    return pl.pallas_call(
        kernel,
        out_shape=jax.ShapeDtypeStruct((1, NCp), jnp.float32),
        grid=(NCp // tc,),
        in_specs=[pl.BlockSpec((HW, tc), lambda i: (0, i))],
        out_specs=pl.BlockSpec((1, tc), lambda i: (0, i)),
        compiler_params=pltpu.CompilerParams(
            dimension_semantics=("parallel",)),
    )


# ------------------------------------------------------------ layer wrappers
def _im2col(x, k, stride, pad, pad_value=0.0):
    # TODO(synk): 3x3 convs still materialize the im2col patch matrix (now in
    # bf16, half the previous traffic) in XLA instead of in-kernel shifted
    # NHWC window reads via a tap grid axis.
    N, H, W, C = x.shape
    xp = jnp.pad(x, ((0, 0), (pad, pad), (pad, pad), (0, 0)),
                 constant_values=pad_value)
    Ho = (H + 2 * pad - k) // stride + 1
    Wo = (W + 2 * pad - k) // stride + 1
    cols = []
    for i in range(k):
        for j in range(k):
            cols.append(xp[:, i:i + stride * (Ho - 1) + 1:stride,
                           j:j + stride * (Wo - 1) + 1:stride, :])
    patches = jnp.stack(cols, axis=3)  # [N, Ho, Wo, k*k, C]
    return patches.reshape(N * Ho * Wo, k * k * C), Ho, Wo


def conv2d(x, wb, k, stride, pad, relu=False, residual=None):
    """x: NHWC (bf16), wb = (w [k*k*Cin, Cout] bf16, bias [Cout] f32)."""
    w, b = wb
    N, H, W, C = x.shape
    cout = w.shape[1]
    if k == 1:
        xs = x[:, ::stride, ::stride, :]
        Ho, Wo = xs.shape[1], xs.shape[2]
        a = xs.reshape(N * Ho * Wo, C)
    else:
        a, Ho, Wo = _im2col(x, k, stride, pad)
    res = residual.reshape(N * Ho * Wo, cout) if residual is not None else None
    out = matmul_bias(a, w, b, residual=res, relu=relu)
    return out.reshape(N, Ho, Wo, cout)


def bn_relu_stem(x, scale, bias):
    """Fused bn1 + ReLU; returns (bn_out, relu_out) in one lane-dense pass."""
    N, H, W, C = x.shape
    assert 128 % C == 0, "stem fused bn/relu expects C dividing 128"
    rep = 128 // C
    xf, T, Rp = _lane_dense(x)
    tr = _pick_rows(Rp)
    s128 = jnp.tile(scale, rep).reshape(1, 128).astype(jnp.float32)
    b128 = jnp.tile(bias, rep).reshape(1, 128).astype(jnp.float32)
    bn_f, relu_f = _get_bn_relu(Rp, tr)(xf, s128, b128)
    bn = bn_f.reshape(-1)[:T].reshape(N, H, W, C)
    relu = relu_f.reshape(-1)[:T].reshape(N, H, W, C)
    return bn, relu


def maxpool_3x3_s2_p1(x):
    """3x3/2 max pool: W-axis taps fold pairwise in XLA (fused, no 9-way
    stacked intermediate), H-axis taps reduce in a lane-dense Pallas kernel."""
    N, H, W, C = x.shape
    xp = jnp.pad(x, ((0, 0), (1, 1), (1, 1), (0, 0)),
                 constant_values=-jnp.inf)
    Ho = (H + 2 - 3) // 2 + 1
    Wo = (W + 2 - 3) // 2 + 1
    wl = 2 * (Wo - 1) + 1
    rowmax = jnp.maximum(
        jnp.maximum(xp[:, :, 0:wl:2, :], xp[:, :, 1:wl + 1:2, :]),
        xp[:, :, 2:wl + 2:2, :])                       # [N, H+2, Wo, C]
    hl = 2 * (Ho - 1) + 1
    h0 = rowmax[:, 0:hl:2]
    h1 = rowmax[:, 1:hl + 1:2]
    h2 = rowmax[:, 2:hl + 2:2]
    f0, T, Rp = _lane_dense(h0)
    f1, _, _ = _lane_dense(h1)
    f2, _, _ = _lane_dense(h2)
    tr = _pick_rows(Rp)
    out = _get_max3(Rp, tr)(f0, f1, f2)
    return out.reshape(-1)[:T].reshape(N, Ho, Wo, C)


def adaptive_avgpool_1x1(x):
    N, H, W, C = x.shape
    HW = H * W
    NC = N * C
    NCp = _round_up(NC, 128)
    if NCp <= 1024:
        tc = NCp
    elif NCp % 512 == 0:
        tc = 512
    else:
        tc = 128
    stacked = jnp.transpose(x.astype(jnp.float32).reshape(N, HW, C),
                            (1, 0, 2)).reshape(HW, NC)
    stacked = jnp.pad(stacked, ((0, 0), (0, NCp - NC)))
    out = _get_spatial_mean(HW, NCp, tc)(stacked)      # [1, NCp]
    return out[0, :NC].reshape(N, C)


# ----------------------------------------------------- deterministic params
class _KeyGen:
    def __init__(self, seed):
        self._base = jax.random.PRNGKey(seed)
        self._i = 0

    def __call__(self):
        self._i += 1
        return jax.random.fold_in(self._base, self._i)


def _conv_w(kg, cin, cout, k):
    fan_in = float(cin * k * k)
    return jax.random.normal(kg(), (k, k, cin, cout), jnp.float32) / (fan_in ** 0.5)


def _bn_raw(kg, c):
    gamma = 1.0 + 0.1 * jax.random.normal(kg(), (c,), jnp.float32)
    beta = 0.1 * jax.random.normal(kg(), (c,), jnp.float32)
    mean = 0.1 * jax.random.normal(kg(), (c,), jnp.float32)
    var = 1.0 + 0.1 * jax.random.uniform(kg(), (c,), jnp.float32)
    return gamma, beta, mean, var


def _conv_bn_folded(kg, cin, cout, k):
    w = _conv_w(kg, cin, cout, k)
    gamma, beta, mean, var = _bn_raw(kg, cout)
    scale = gamma / jnp.sqrt(var + EPS)
    w = (w * scale).reshape(k * k * cin, cout).astype(jnp.bfloat16)
    bias = (beta - mean * scale).astype(jnp.float32)
    return w, bias


def _block_params(kg, cin, planes, downsample):
    p = {'conv1': _conv_bn_folded(kg, cin, planes, 1),
         'conv2': _conv_bn_folded(kg, planes, planes, 3),
         'conv3': _conv_bn_folded(kg, planes, planes * 4, 1)}
    if downsample:
        p['ds'] = _conv_bn_folded(kg, cin, planes * 4, 1)
    return p


def _make_layer_params(kg, cin, planes, blocks):
    first = _block_params(kg, cin, planes, downsample=True)
    rest = [_block_params(kg, planes * 4, planes, downsample=False)
            for _ in range(blocks - 1)]
    rest = (jax.tree_util.tree_map(lambda *xs: jnp.stack(xs, 0), *rest)
            if rest else None)
    return {'first': first, 'rest': rest}


def make_resnet152_params(seed=0):
    kg = _KeyGen(seed)
    params = {}
    w1 = _conv_w(kg, 3, 64, 7).reshape(7 * 7 * 3, 64).astype(jnp.bfloat16)
    params['conv1'] = (w1, jnp.zeros((64,), jnp.float32))
    gamma, beta, mean, var = _bn_raw(kg, 64)
    scale = gamma / jnp.sqrt(var + EPS)
    params['bn1'] = (scale, beta - mean * scale)
    params['layer1'] = _make_layer_params(kg, 64, 64, 3)
    params['layer2'] = _make_layer_params(kg, 256, 128, 8)
    params['layer3'] = _make_layer_params(kg, 512, 256, 36)
    params['layer4'] = _make_layer_params(kg, 1024, 512, 3)
    return params


# ----------------------------------------------------------------- forward
@jax.jit
def _stem(x_nchw, conv1_w, conv1_b, bn_scale, bn_bias):
    x = jnp.transpose(x_nchw, (0, 2, 3, 1)).astype(jnp.bfloat16)   # NHWC
    c1 = conv2d(x, (conv1_w, conv1_b), 7, 2, 3, relu=False)        # conv1
    bn, r = bn_relu_stem(c1, bn_scale, bn_bias)                    # bn1 + relu
    mp = maxpool_3x3_s2_p1(r)                                      # maxpool
    return c1, bn, r, mp


def _bottleneck(x, p, stride):
    identity = x
    out = conv2d(x, p['conv1'], 1, 1, 0, relu=True)
    out = conv2d(out, p['conv2'], 3, stride, 1, relu=True)
    if 'ds' in p:
        identity = conv2d(x, p['ds'], 1, stride, 0, relu=False)
    out = conv2d(out, p['conv3'], 1, 1, 0, relu=True, residual=identity)
    return out


@functools.partial(jax.jit, static_argnames=('stride',))
def _layer(x, first, rest, stride):
    """One ResNet layer: first (downsample) block + scan over identical blocks."""
    x = _bottleneck(x, first, stride)
    if rest is not None:
        def body(h, p):
            return _bottleneck(h, p, 1), None
        x, _ = jax.lax.scan(body, x, rest)
    return x


@jax.jit
def _avgpool(x):
    return adaptive_avgpool_1x1(x)


def resnet152_forward(x_nchw, params):
    """Returns the 9 intermediate outputs (NCHW, f32) like the PyTorch module."""
    layers = []
    c1, bn, r, mp = _stem(x_nchw, params['conv1'][0], params['conv1'][1],
                          params['bn1'][0], params['bn1'][1])
    layers.append(_to_nchw(c1))                                    # 0: conv1
    layers.append(_to_nchw(bn))                                    # 1: bn1
    layers.append(_to_nchw(r))                                     # 2: relu
    layers.append(_to_nchw(mp))                                    # 3: maxpool
    x = mp
    for name, layer_stride in (('layer1', 1), ('layer2', 2),
                               ('layer3', 2), ('layer4', 2)):      # 4..7
        x = _layer(x, params[name]['first'], params[name]['rest'],
                   stride=layer_stride)
        layers.append(_to_nchw(x))
    pooled = _avgpool(x)                                           # 8: avgpool
    layers.append(pooled.reshape(pooled.shape[0], pooled.shape[1], 1, 1))
    return layers


if __name__ == "__main__":
    params = make_resnet152_params(seed=0)
    x = jax.random.normal(jax.random.PRNGKey(0), (2, 3, 32, 32), jnp.float32)
    outs = resnet152_forward(x, params)
    outs = jax.block_until_ready(outs)

    expected_channels = [64, 64, 64, 64, 256, 512, 1024, 2048, 2048]
    assert len(outs) == 9
    for o, c in zip(outs, expected_channels):
        assert o.ndim == 4 and o.shape[0] == 2 and o.shape[1] == c
        assert bool(jnp.all(jnp.isfinite(o)))
    print("KERNEL_OK")
</pallas_src>

<mosaic_0001>
module attributes {stable_mosaic.version = 11 : i64} {
  func.func @kernel(%arg0: i32, %arg1: i32, %arg2: i32, %arg3: memref<256x256xbf16, #tpu.memory_space<vmem>>, %arg4: memref<256x128xbf16, #tpu.memory_space<vmem>>, %arg5: memref<1x128xf32, #tpu.memory_space<vmem>>, %arg6: memref<256x128xbf16, #tpu.memory_space<vmem>>, %arg7: memref<256x128xf32, #tpu.memory_space<vmem>>) attributes {dimension_semantics = [#tpu.dimension_semantics<parallel>, #tpu.dimension_semantics<parallel>, #tpu.dimension_semantics<arbitrary>], iteration_bounds = array<i64: 2, 1, 1>, scalar_prefetch = 0 : i64, scratch_operands = 1 : i64, tpu.core_type = #tpu.core_type<tc>, window_params = [{transform_indices = @transform_0, window_bounds = array<i64: 256, 256>}, {transform_indices = @transform_1, window_bounds = array<i64: 256, 128>}, {transform_indices = @transform_2, window_bounds = array<i64: 1, 128>}, {transform_indices = @transform_3, window_bounds = array<i64: 256, 128>}]} {
    %c0 = arith.constant 0 : index
    %c0_0 = arith.constant 0 : index
    %0 = vector.load %arg3[%c0, %c0_0] : memref<256x256xbf16, #tpu.memory_space<vmem>>, vector<256x256xbf16>
    %c0_1 = arith.constant 0 : index
    %c0_2 = arith.constant 0 : index
    %1 = vector.load %arg4[%c0_1, %c0_2] : memref<256x128xbf16, #tpu.memory_space<vmem>>, vector<256x128xbf16>
    %cst = arith.constant dense<0.000000e+00> : vector<256x128xf32>
    %2 = tpu.matmul %0, %1, %cst {dimension_numbers = #tpu.dot_dimension_numbers<[1], [0], [0], [1], [0, 0, 1, 1], [], []>} : vector<256x256xbf16>, vector<256x128xbf16>, vector<256x128xf32> -> vector<256x128xf32>
    %c0_i32 = arith.constant 0 : i32
    %3 = arith.cmpi eq, %arg2, %c0_i32 : i32
    %4 = arith.extui %3 : i1 to i32
    %c0_i32_3 = arith.constant 0 : i32
    %5 = arith.cmpi ne, %4, %c0_i32_3 : i32
    scf.if %5 {
      %c0_8 = arith.constant 0 : index
      %c0_9 = arith.constant 0 : index
      %12 = vector.load %arg7[%c0_8, %c0_9] : memref<256x128xf32, #tpu.memory_space<vmem>>, vector<256x128xf32>
      tpu.vector_store %arg7[%c0_8, %c0_9], %2 {strides = array<i32>} : memref<256x128xf32, #tpu.memory_space<vmem>>, vector<256x128xf32>,
    } else {
    }
    %c0_i32_4 = arith.constant 0 : i32
    %6 = arith.cmpi ne, %arg2, %c0_i32_4 : i32
    %7 = arith.extui %6 : i1 to i32
    %c0_i32_5 = arith.constant 0 : i32
    %8 = arith.cmpi ne, %7, %c0_i32_5 : i32
    scf.if %8 {
      %c0_8 = arith.constant 0 : index
      %c0_9 = arith.constant 0 : index
      %12 = vector.load %arg7[%c0_8, %c0_9] : memref<256x128xf32, #tpu.memory_space<vmem>>, vector<256x128xf32>
      %13 = arith.addf %12, %2 : vector<256x128xf32>
      %c0_10 = arith.constant 0 : index
      %c0_11 = arith.constant 0 : index
      %14 = vector.load %arg7[%c0_10, %c0_11] : memref<256x128xf32, #tpu.memory_space<vmem>>, vector<256x128xf32>
      tpu.vector_store %arg7[%c0_10, %c0_11], %13 {strides = array<i32>} : memref<256x128xf32, #tpu.memory_space<vmem>>, vector<256x128xf32>,
    } else {
    }
    %c0_i32_6 = arith.constant 0 : i32
    %9 = arith.cmpi eq, %arg2, %c0_i32_6 : i32
    %10 = arith.extui %9 : i1 to i32
    %c0_i32_7 = arith.constant 0 : i32
    %11 = arith.cmpi ne, %10, %c0_i32_7 : i32
    scf.if %11 {
      %c0_8 = arith.constant 0 : index
      %c0_9 = arith.constant 0 : index
      %12 = vector.load %arg7[%c0_8, %c0_9] : memref<256x128xf32, #tpu.memory_space<vmem>>, vector<256x128xf32>
      %c0_10 = arith.constant 0 : index
      %c0_11 = arith.constant 0 : index
      %13 = vector.load %arg5[%c0_10, %c0_11] : memref<1x128xf32, #tpu.memory_space<vmem>>, vector<1x128xf32>
      %14 = vector.broadcast %13 : vector<1x128xf32> to vector<256x128xf32>
      %15 = arith.addf %12, %14 : vector<256x128xf32>
      %16 = arith.truncf %15 : vector<256x128xf32> to vector<256x128xbf16>
      %c0_12 = arith.constant 0 : index
      %c0_13 = arith.constant 0 : index
      %17 = vector.load %arg6[%c0_12, %c0_13] : memref<256x128xbf16, #tpu.memory_space<vmem>>, vector<256x128xbf16>
      tpu.vector_store %arg6[%c0_12, %c0_13], %16 {strides = array<i32>} : memref<256x128xbf16, #tpu.memory_space<vmem>>, vector<256x128xbf16>,
    } else {
    }
    return
  }
  func.func @transform_0(%arg0: i32, %arg1: i32, %arg2: i32) -> (i32, i32) {
    %c0_i32 = arith.constant 0 : i32
    return %arg0, %arg2 : i32, i32
  }
  func.func @transform_1(%arg0: i32, %arg1: i32, %arg2: i32) -> (i32, i32) {
    %c0_i32 = arith.constant 0 : i32
    return %arg2, %arg1 : i32, i32
  }
  func.func @transform_2(%arg0: i32, %arg1: i32, %arg2: i32) -> (i32, i32) {
    %c0_i32 = arith.constant 0 : i32
    %c0_i32_0 = arith.constant 0 : i32
    return %c0_i32, %arg1 : i32, i32
  }
  func.func @transform_3(%arg0: i32, %arg1: i32, %arg2: i32) -> (i32, i32) {
    %c0_i32 = arith.constant 0 : i32
    return %arg0, %arg1 : i32, i32
  }
}

module attributes {stable_mosaic.version = 11 : i64} {
  func.func @kernel(%arg0: i32, %arg1: memref<256x128xbf16, #tpu.memory_space<vmem>>, %arg2: memref<1x128xf32, #tpu.memory_space<vmem>>, %arg3: memref<1x128xf32, #tpu.memory_space<vmem>>, %arg4: memref<256x128xbf16, #tpu.memory_space<vmem>>, %arg5: memref<256x128xbf16, #tpu.memory_space<vmem>>) attributes {dimension_semantics = [#tpu.dimension_semantics<parallel>], iteration_bounds = array<i64: 1>, scalar_prefetch = 0 : i64, scratch_operands = 0 : i64, tpu.core_type = #tpu.core_type<tc>, window_params = [{transform_indices = @transform_0, window_bounds = array<i64: 256, 128>}, {pipeline_mode = #tpu.pipeline_mode<synchronous>, transform_indices = @transform_1, window_bounds = array<i64: 1, 128>}, {pipeline_mode = #tpu.pipeline_mode<synchronous>, transform_indices = @transform_2, window_bounds = array<i64: 1, 128>}, {transform_indices = @transform_3, window_bounds = array<i64: 256, 128>}, {transform_indices = @transform_4, window_bounds = array<i64: 256, 128>}]} {
    %c0 = arith.constant 0 : index
    %c0_0 = arith.constant 0 : index
    %0 = vector.load %arg1[%c0, %c0_0] : memref<256x128xbf16, #tpu.memory_space<vmem>>, vector<256x128xbf16>
    %1 = arith.extf %0 : vector<256x128xbf16> to vector<256x128xf32>
    %c0_1 = arith.constant 0 : index
    %c0_2 = arith.constant 0 : index
    %2 = vector.load %arg2[%c0_1, %c0_2] : memref<1x128xf32, #tpu.memory_space<vmem>>, vector<1x128xf32>
    %3 = vector.broadcast %2 : vector<1x128xf32> to vector<256x128xf32>
    %4 = arith.mulf %1, %3 : vector<256x128xf32>
    %c0_3 = arith.constant 0 : index
    %c0_4 = arith.constant 0 : index
    %5 = vector.load %arg3[%c0_3, %c0_4] : memref<1x128xf32, #tpu.memory_space<vmem>>, vector<1x128xf32>
    %6 = vector.broadcast %5 : vector<1x128xf32> to vector<256x128xf32>
    %7 = arith.addf %4, %6 : vector<256x128xf32>
    %8 = arith.truncf %7 : vector<256x128xf32> to vector<256x128xbf16>
    %c0_5 = arith.constant 0 : index
    %c0_6 = arith.constant 0 : index
    %9 = vector.load %arg4[%c0_5, %c0_6] : memref<256x128xbf16, #tpu.memory_space<vmem>>, vector<256x128xbf16>
    tpu.vector_store %arg4[%c0_5, %c0_6], %8 {strides = array<i32>} : memref<256x128xbf16, #tpu.memory_space<vmem>>, vector<256x128xbf16>,
    %cst = arith.constant 0.000000e+00 : f32
    %10 = vector.broadcast %cst : f32 to vector<256x128xf32>
    %11 = arith.maximumf %7, %10 : vector<256x128xf32>
    %12 = arith.truncf %11 : vector<256x128xf32> to vector<256x128xbf16>
    %c0_7 = arith.constant 0 : index
    %c0_8 = arith.constant 0 : index
    %13 = vector.load %arg5[%c0_7, %c0_8] : memref<256x128xbf16, #tpu.memory_space<vmem>>, vector<256x128xbf16>
    tpu.vector_store %arg5[%c0_7, %c0_8], %12 {strides = array<i32>} : memref<256x128xbf16, #tpu.memory_space<vmem>>, vector<256x128xbf16>,
    return
  }
  func.func @transform_0(%arg0: i32) -> (i32, i32) {
    %c0_i32 = arith.constant 0 : i32
    %c0_i32_0 = arith.constant 0 : i32
    return %arg0, %c0_i32 : i32, i32
  }
  func.func @transform_1(%arg0: i32) -> (i32, i32) {
    %c0_i32 = arith.constant 0 : i32
    %c0_i32_0 = arith.constant 0 : i32
    %c0_i32_1 = arith.constant 0 : i32
    return %c0_i32, %c0_i32_0 : i32, i32
  }
  func.func @transform_2(%arg0: i32) -> (i32, i32) {
    %c0_i32 = arith.constant 0 : i32
    %c0_i32_0 = arith.constant 0 : i32
    %c0_i32_1 = arith.constant 0 : i32
    return %c0_i32, %c0_i32_0 : i32, i32
  }
  func.func @transform_3(%arg0: i32) -> (i32, i32) {
    %c0_i32 = arith.constant 0 : i32
    %c0_i32_0 = arith.constant 0 : i32
    return %arg0, %c0_i32 : i32, i32
  }
  func.func @transform_4(%arg0: i32) -> (i32, i32) {
    %c0_i32 = arith.constant 0 : i32
    %c0_i32_0 = arith.constant 0 : i32
    return %arg0, %c0_i32 : i32, i32
  }
}

module attributes {stable_mosaic.version = 11 : i64} {
  func.func @kernel(%arg0: i32, %arg1: memref<64x128xbf16, #tpu.memory_space<vmem>>, %arg2: memref<64x128xbf16, #tpu.memory_space<vmem>>, %arg3: memref<64x128xbf16, #tpu.memory_space<vmem>>, %arg4: memref<64x128xbf16, #tpu.memory_space<vmem>>) attributes {dimension_semantics = [#tpu.dimension_semantics<parallel>], iteration_bounds = array<i64: 1>, scalar_prefetch = 0 : i64, scratch_operands = 0 : i64, tpu.core_type = #tpu.core_type<tc>, window_params = [{transform_indices = @transform_0, window_bounds = array<i64: 64, 128>}, {transform_indices = @transform_1, window_bounds = array<i64: 64, 128>}, {transform_indices = @transform_2, window_bounds = array<i64: 64, 128>}, {transform_indices = @transform_3, window_bounds = array<i64: 64, 128>}]} {
    %c0 = arith.constant 0 : index
    %c0_0 = arith.constant 0 : index
    %0 = vector.load %arg1[%c0, %c0_0] : memref<64x128xbf16, #tpu.memory_space<vmem>>, vector<64x128xbf16>
    %c0_1 = arith.constant 0 : index
    %c0_2 = arith.constant 0 : index
    %1 = vector.load %arg2[%c0_1, %c0_2] : memref<64x128xbf16, #tpu.memory_space<vmem>>, vector<64x128xbf16>
    %2 = arith.maximumf %0, %1 : vector<64x128xbf16>
    %c0_3 = arith.constant 0 : index
    %c0_4 = arith.constant 0 : index
    %3 = vector.load %arg3[%c0_3, %c0_4] : memref<64x128xbf16, #tpu.memory_space<vmem>>, vector<64x128xbf16>
    %4 = arith.maximumf %2, %3 : vector<64x128xbf16>
    %c0_5 = arith.constant 0 : index
    %c0_6 = arith.constant 0 : index
    %5 = vector.load %arg4[%c0_5, %c0_6] : memref<64x128xbf16, #tpu.memory_space<vmem>>, vector<64x128xbf16>
    tpu.vector_store %arg4[%c0_5, %c0_6], %4 {strides = array<i32>} : memref<64x128xbf16, #tpu.memory_space<vmem>>, vector<64x128xbf16>,
    return
  }
  func.func @transform_0(%arg0: i32) -> (i32, i32) {
    %c0_i32 = arith.constant 0 : i32
    %c0_i32_0 = arith.constant 0 : i32
    return %arg0, %c0_i32 : i32, i32
  }
  func.func @transform_1(%arg0: i32) -> (i32, i32) {
    %c0_i32 = arith.constant 0 : i32
    %c0_i32_0 = arith.constant 0 : i32
    return %arg0, %c0_i32 : i32, i32
  }
  func.func @transform_2(%arg0: i32) -> (i32, i32) {
    %c0_i32 = arith.constant 0 : i32
    %c0_i32_0 = arith.constant 0 : i32
    return %arg0, %c0_i32 : i32, i32
  }
  func.func @transform_3(%arg0: i32) -> (i32, i32) {
    %c0_i32 = arith.constant 0 : i32
    %c0_i32_0 = arith.constant 0 : i32
    return %arg0, %c0_i32 : i32, i32
  }
}

</mosaic_0001>

<bundles_post_ra>
// kernel: tile.13
= control target key start
LH: loop header
LB: loop body
LE: loop exit
PB: predicated region body
PF: predicated region fallthrough
CT: control target
= control target key end

     0   :  { %s22_s0 = inlined_call_operand.vmem [shape: f32[64], index: 0, kind: input, shape index: {}]   ;;  %s23_s1 = inlined_call_operand.vmem [shape: f32[2,64], index: 1, kind: output, shape index: {}]  }
   0x1   :  { %v4_v0 = vld [vmem:[%s22_s0] ss:$0 sm:$0xff] }
   0x2   :  { %5 = vst [vmem:[%s23_s1] sm:$0x3] %v4_v0 }

// kernel: tile.14
= control target key start
LH: loop header
LB: loop body
LE: loop exit
PB: predicated region body
PF: predicated region fallthrough
CT: control target
= control target key end

     0   :  { %vm7_vm0 = vcmask 523264   ;;  %vm13_vm1 = vcmask 1048064   ;;  %s39_s0 = inlined_call_operand.vmem [shape: f32[2,64], index: 0, kind: input, shape index: {}]   ;;  %s40_s1 = inlined_call_operand.vmem [shape: f32[1,128], index: 1, kind: output, shape index: {}]  }
   0x1   :  { %v4_v0 = vld [vmem:[%s39_s0] sm:$0x3]  ;;  %s22_s0 = smov 64  }
   0x2   :  { %5 = vst [vmem:[#allocation1] sm:$0x3] %v4_v0 }
   0x9   :  { %v10_v1 = vld [vmem:[#allocation1 + $0x1] sm:$0x1]   ;;  %v6_v2 = vld [vmem:[#allocation1] sm:$0x1]  }
   0xa   :  { %11 = vrot.lane.b32.xlu0 %v10_v1, %s22_s0  ;;  %8 = vst.msk [vmem:[#allocation0] sm:$0x1] %vm7_vm0, %v6_v2  }
  0x7c   :  { %v12_v3 = vpop.permute.xlu0 %11  }
  0x7d   :  { %14 = vst.msk [vmem:[#allocation0] sm:$0x1] %vm13_vm1, %v12_v3  }
  0x84   :  { %v17_v4 = vld [vmem:[#allocation0] sm:$0x1] }
  0x85   :  { %20 = vst [vmem:[%s40_s1] sm:$0x1] %v17_v4 }

// kernel: _stem.4
= control target key start
LH: loop header
LB: loop body
LE: loop exit
PB: predicated region body
PF: predicated region fallthrough
CT: control target
= control target key end

     0   :  { %s962_s0 = inlined_call_operand.vmem [shape: bf16[256,128], index: 0, kind: input, shape index: {}]   ;;  %s963_s1 = inlined_call_operand.vmem [shape: f32[1,128], index: 1, kind: input, shape index: {}]   ;;  %s964_s2 = inlined_call_operand.vmem [shape: f32[1,128], index: 2, kind: input, shape index: {}]   ;;  %s965_s3 = inlined_call_operand.vmem [shape: bf16[256,128], index: 3, kind: output, shape index: {0}]   ;;  %s966_s4 = inlined_call_operand.vmem [shape: bf16[256,128], index: 4, kind: output, shape index: {1}]  }
   0x1   :  { %v321_v0 = vld [vmem:[%s962_s0] sm:$0xff]   ;;  %v544_v5 = vld [vmem:[%s962_s0 + $0x8] sm:$0xff]   ;;  %v545_v8 = vld [vmem:[%s962_s0 + $0x10] sm:$0xff]  }
   0x2   :  { %v622_v1 = vld [vmem:[%s963_s1] ss:$0 sm:$0xff]  ;;  %v322_v2 = vunpack.c.l.bf16 %v321_v0  ;;  %v323_v3 = vunpack.c.h.bf16 %v321_v0  ;;  %v326_v6 = vunpack.c.l.bf16 %v544_v5  ;;  %v327_v7 = vunpack.c.h.bf16 %v544_v5  ;;  %v546_v9 = vld [vmem:[%s962_s0 + $0x18] sm:$0xff]   ;;  %v548_v27 = vld [vmem:[%s962_s0 + $0x28] sm:$0xff]  }
   0x3   :  { %v627_v4 = vld [vmem:[%s964_s2] ss:$0 sm:$0xff]  ;;  %v330_v12 = vunpack.c.l.bf16 %v545_v8  ;;  %v331_v13 = vunpack.c.h.bf16 %v545_v8  ;;  %v334_v16 = vunpack.c.l.bf16 %v546_v9  ;;  %v335_v17 = vunpack.c.h.bf16 %v546_v9  ;;  %v549_v32 = vld [vmem:[%s962_s0 + $0x30] sm:$0xff]   ;;  %v550_v37 = vld [vmem:[%s962_s0 + $0x38] sm:$0xff]  }
   0x4   :  { %v84_v10 = vmul.f32 %v622_v1, %v322_v2  ;;  %v85_v11 = vmul.f32 %v622_v1, %v323_v3  ;;  %v86_v14 = vmul.f32 %v622_v1, %v326_v6  ;;  %v87_v15 = vmul.f32 %v622_v1, %v327_v7  ;;  %v547_v18 = vld [vmem:[%s962_s0 + $0x20] sm:$0xff]   ;;  %v552_v59 = vld [vmem:[%s962_s0 + $0x48] sm:$0xff]   ;;  %v553_v0 = vld [vmem:[%s962_s0 + $0x50] sm:$0xff]  }
   0x5   :  { %v88_v21 = vmul.f32 %v622_v1, %v330_v12  ;;  %v89_v22 = vmul.f32 %v622_v1, %v331_v13  ;;  %v90_v25 = vmul.f32 %v622_v1, %v334_v16  ;;  %v91_v26 = vmul.f32 %v622_v1, %v335_v17  ;;  %v551_v46 = vld [vmem:[%s962_s0 + $0x40] sm:$0xff]   ;;  %v554_v7 = vld [vmem:[%s962_s0 + $0x58] sm:$0xff]  }
   0x6   :  { %v646_v19 = vadd.f32 %v627_v4, %v84_v10  ;;  %v649_v20 = vadd.f32 %v627_v4, %v85_v11  ;;  %v654_v23 = vadd.f32 %v627_v4, %v86_v14  ;;  %v657_v24 = vadd.f32 %v627_v4, %v87_v15  ;;  %v555_v16 = vld [vmem:[%s962_s0 + $0x60] sm:$0xff]  }
   0x7   :  { %v667_v29 = vadd.f32 %v627_v4, %v88_v21  ;;  %v670_v30 = vadd.f32 %v627_v4, %v89_v22  ;;  %v338_v31 = vunpack.c.l.bf16 %v547_v18  ;;  %v678_v34 = vadd.f32 %v627_v4, %v90_v25 }
   0x8   :  { %v387_v28 = vpack.c.bf16 %v649_v20, %v646_v19  ;;  %v392_v33 = vpack.c.bf16 %v657_v24, %v654_v23  ;;  %v681_v35 = vadd.f32 %v627_v4, %v91_v26  ;;  %v339_v36 = vunpack.c.h.bf16 %v547_v18 }
   0x9   :  { %v397_v38 = vpack.c.bf16 %v670_v30, %v667_v29  ;;  %v92_v39 = vmul.f32 %v622_v1, %v338_v31  ;;  %v342_v40 = vunpack.c.l.bf16 %v548_v27  ;;  %v343_v41 = vunpack.c.h.bf16 %v548_v27 }
   0xa   :  { %388 = vst [vmem:[%s965_s3] sm:$0xff] %v387_v28   ;;  %v402_v42 = vpack.c.bf16 %v681_v35, %v678_v34  ;;  %v93_v43 = vmul.f32 %v622_v1, %v339_v36  ;;  %v346_v44 = vunpack.c.l.bf16 %v549_v32  ;;  %v347_v45 = vunpack.c.h.bf16 %v549_v32 }
   0xb   :  { %559 = vst [vmem:[%s965_s3 + $0x8] sm:$0xff] %v392_v33   ;;  %v705_v47 = vadd.f32 %v627_v4, %v92_v39  ;;  %v94_v48 = vmul.f32 %v622_v1, %v342_v40  ;;  %v95_v49 = vmul.f32 %v622_v1, %v343_v41  ;;  %v350_v50 = vunpack.c.l.bf16 %v550_v37 }
   0xc   :  { %560 = vst [vmem:[%s965_s3 + $0x10] sm:$0xff] %v397_v38   ;;  %v713_v51 = vadd.f32 %v627_v4, %v93_v43  ;;  %v96_v52 = vmul.f32 %v622_v1, %v346_v44  ;;  %v97_v53 = vmul.f32 %v622_v1, %v347_v45  ;;  %v351_v54 = vunpack.c.h.bf16 %v550_v37  ;;  %v556_v37 = vld [vmem:[%s962_s0 + $0x68] sm:$0xff]  }
   0xd   :  { %561 = vst [vmem:[%s965_s3 + $0x18] sm:$0xff] %v402_v42   ;;  %v718_v55 = vadd.f32 %v627_v4, %v94_v48  ;;  %v721_v56 = vadd.f32 %v627_v4, %v95_v49  ;;  %v98_v57 = vmul.f32 %v622_v1, %v350_v50  ;;  %v354_v58 = vunpack.c.l.bf16 %v551_v46  ;;  %v557_v42 = vld [vmem:[%s962_s0 + $0x70] sm:$0xff]   ;;  %v558_v48 = vld [vmem:[%s962_s0 + $0x78] sm:$0xff]  }
   0xe   :  { %v407_v60 = vpack.c.bf16 %v713_v51, %v705_v47  ;;  %v730_v61 = vadd.f32 %v627_v4, %v96_v52  ;;  %v733_v62 = vadd.f32 %v627_v4, %v97_v53  ;;  %v99_v63 = vmul.f32 %v622_v1, %v351_v54 }
   0xf   :  { %v412_v2 = vpack.c.bf16 %v721_v56, %v718_v55  ;;  %v742_v3 = vadd.f32 %v627_v4, %v98_v57  ;;  %v355_v5 = vunpack.c.h.bf16 %v551_v46  ;;  %v100_v6 = vmul.f32 %v622_v1, %v354_v58 }
  0x10   :  { %562 = vst [vmem:[%s965_s3 + $0x20] sm:$0xff] %v407_v60   ;;  %v417_v8 = vpack.c.bf16 %v733_v62, %v730_v61  ;;  %v754_v9 = vadd.f32 %v627_v4, %v99_v63  ;;  %v358_v10 = vunpack.c.l.bf16 %v552_v59  ;;  %v359_v11 = vunpack.c.h.bf16 %v552_v59 }
  0x11   :  { %563 = vst [vmem:[%s965_s3 + $0x28] sm:$0xff] %v412_v2   ;;  %v101_v12 = vmul.f32 %v622_v1, %v355_v5  ;;  %v761_v13 = vadd.f32 %v627_v4, %v100_v6  ;;  %v362_v14 = vunpack.c.l.bf16 %v553_v0  ;;  %v363_v15 = vunpack.c.h.bf16 %v553_v0 }
  0x12   :  { %564 = vst [vmem:[%s965_s3 + $0x30] sm:$0xff] %v417_v8   ;;  %v422_v17 = vpack.c.bf16 %v754_v9, %v742_v3  ;;  %v102_v18 = vmul.f32 %v622_v1, %v358_v10  ;;  %v103_v21 = vmul.f32 %v622_v1, %v359_v11  ;;  %v366_v22 = vunpack.c.l.bf16 %v554_v7 }
  0x13   :  { %v774_v25 = vadd.f32 %v627_v4, %v101_v12  ;;  %v104_v26 = vmul.f32 %v622_v1, %v362_v14  ;;  %v105_v27 = vmul.f32 %v622_v1, %v363_v15  ;;  %v367_v28 = vunpack.c.h.bf16 %v554_v7 }
  0x14   :  { %565 = vst [vmem:[%s965_s3 + $0x38] sm:$0xff] %v422_v17   ;;  %v782_v31 = vadd.f32 %v627_v4, %v102_v18  ;;  %v785_v32 = vadd.f32 %v627_v4, %v103_v21  ;;  %v106_v33 = vmul.f32 %v622_v1, %v366_v22  ;;  %v370_v36 = vunpack.c.l.bf16 %v555_v16 }
  0x15   :  { %v427_v38 = vpack.c.bf16 %v774_v25, %v761_v13  ;;  %v794_v39 = vadd.f32 %v627_v4, %v104_v26  ;;  %v797_v40 = vadd.f32 %v627_v4, %v105_v27  ;;  %v107_v41 = vmul.f32 %v622_v1, %v367_v28 }
  0x16   :  { %v432_v43 = vpack.c.bf16 %v785_v32, %v782_v31  ;;  %v806_v44 = vadd.f32 %v627_v4, %v106_v33  ;;  %v371_v45 = vunpack.c.h.bf16 %v555_v16  ;;  %v108_v46 = vmul.f32 %v622_v1, %v370_v36 }
  0x17   :  { %566 = vst [vmem:[%s965_s3 + $0x40] sm:$0xff] %v427_v38   ;;  %v437_v49 = vpack.c.bf16 %v797_v40, %v794_v39  ;;  %v818_v50 = vadd.f32 %v627_v4, %v107_v41  ;;  %v374_v52 = vunpack.c.l.bf16 %v556_v37  ;;  %v375_v53 = vunpack.c.h.bf16 %v556_v37 }
  0x18   :  { %567 = vst [vmem:[%s965_s3 + $0x48] sm:$0xff] %v432_v43   ;;  %v109_v54 = vmul.f32 %v622_v1, %v371_v45  ;;  %v825_v57 = vadd.f32 %v627_v4, %v108_v46  ;;  %v378_v58 = vunpack.c.l.bf16 %v557_v42  ;;  %v379_v59 = vunpack.c.h.bf16 %v557_v42 }
  0x19   :  { %568 = vst [vmem:[%s965_s3 + $0x50] sm:$0xff] %v437_v49   ;;  %v442_v60 = vpack.c.bf16 %v818_v50, %v806_v44  ;;  %v110_v63 = vmul.f32 %v622_v1, %v374_v52  ;;  %v111_v0 = vmul.f32 %v622_v1, %v375_v53  ;;  %v382_v2 = vunpack.c.l.bf16 %v558_v48 }
  0x1a   :  { %v835_v5 = vadd.f32 %v627_v4, %v109_v54  ;;  %v112_v6 = vmul.f32 %v622_v1, %v378_v58  ;;  %v113_v7 = vmul.f32 %v622_v1, %v379_v59  ;;  %v383_v8 = vunpack.c.h.bf16 %v558_v48 }
  0x1b   :  { %569 = vst [vmem:[%s965_s3 + $0x58] sm:$0xff] %v442_v60   ;;  %v843_v10 = vadd.f32 %v627_v4, %v110_v63  ;;  %v846_v11 = vadd.f32 %v627_v4, %v111_v0  ;;  %v114_v12 = vmul.f32 %v622_v1, %v382_v2  ;;  %v216_v14 = vmax.f32 %v646_v19, 0.0 }
  0x1c   :  { %v447_v15 = vpack.c.bf16 %v835_v5, %v825_v57  ;;  %v853_v16 = vadd.f32 %v627_v4, %v112_v6  ;;  %v856_v17 = vadd.f32 %v627_v4, %v113_v7  ;;  %v115_v18 = vmul.f32 %v622_v1, %v383_v8 }
  0x1d   :  { %v452_v21 = vpack.c.bf16 %v846_v11, %v843_v10  ;;  %v862_v22 = vadd.f32 %v627_v4, %v114_v12  ;;  %v217_v26 = vmax.f32 %v649_v20, 0.0  ;;  %v218_v19 = vmax.f32 %v654_v23, 0.0 }
  0x1e   :  { %570 = vst [vmem:[%s965_s3 + $0x60] sm:$0xff] %v447_v15   ;;  %v457_v27 = vpack.c.bf16 %v856_v17, %v853_v16  ;;  %v872_v28 = vadd.f32 %v627_v4, %v115_v18  ;;  %v219_v1 = vmax.f32 %v657_v24, 0.0  ;;  %v220_v33 = vmax.f32 %v667_v29, 0.0 }
  0x1f   :  { %571 = vst [vmem:[%s965_s3 + $0x68] sm:$0xff] %v452_v21   ;;  %v467_v20 = vpack.c.bf16 %v217_v26, %v216_v14  ;;  %v221_v23 = vmax.f32 %v670_v30, 0.0  ;;  %v222_v36 = vmax.f32 %v678_v34, 0.0  ;;  %v223_v37 = vmax.f32 %v681_v35, 0.0 }
  0x20   :  { %572 = vst [vmem:[%s965_s3 + $0x70] sm:$0xff] %v457_v27   ;;  %v462_v4 = vpack.c.bf16 %v872_v28, %v862_v22  ;;  %v472_v24 = vpack.c.bf16 %v219_v1, %v218_v19  ;;  %v224_v29 = vmax.f32 %v705_v47, 0.0  ;;  %v225_v38 = vmax.f32 %v713_v51, 0.0 }
  0x21   :  { %468 = vst [vmem:[%s966_s4] sm:$0xff] %v467_v20   ;;  %v477_v30 = vpack.c.bf16 %v221_v23, %v220_v33  ;;  %v482_v34 = vpack.c.bf16 %v223_v37, %v222_v36  ;;  %v226_v35 = vmax.f32 %v718_v55, 0.0  ;;  %v227_v41 = vmax.f32 %v721_v56, 0.0 }
  0x22   :  { %573 = vst [vmem:[%s965_s3 + $0x78] sm:$0xff] %v462_v4   ;;  %v487_v42 = vpack.c.bf16 %v225_v38, %v224_v29  ;;  %v228_v43 = vmax.f32 %v730_v61, 0.0  ;;  %v229_v47 = vmax.f32 %v733_v62, 0.0  ;;  %v230_v51 = vmax.f32 %v742_v3, 0.0 }
  0x23   :  { %574 = vst [vmem:[%s966_s4 + $0x8] sm:$0xff] %v472_v24   ;;  %v492_v45 = vpack.c.bf16 %v227_v41, %v226_v35  ;;  %v231_v55 = vmax.f32 %v754_v9, 0.0  ;;  %v232_v56 = vmax.f32 %v761_v13, 0.0  ;;  %v233_v46 = vmax.f32 %v774_v25, 0.0 }
  0x24   :  { %575 = vst [vmem:[%s966_s4 + $0x10] sm:$0xff] %v477_v30   ;;  %v497_v61 = vpack.c.bf16 %v229_v47, %v228_v43  ;;  %v234_v62 = vmax.f32 %v782_v31, 0.0  ;;  %v235_v3 = vmax.f32 %v785_v32, 0.0  ;;  %v236_v48 = vmax.f32 %v794_v39, 0.0 }
  0x25   :  { %576 = vst [vmem:[%s966_s4 + $0x18] sm:$0xff] %v482_v34   ;;  %v502_v9 = vpack.c.bf16 %v231_v55, %v230_v51  ;;  %v237_v13 = vmax.f32 %v797_v40, 0.0  ;;  %v238_v25 = vmax.f32 %v806_v44, 0.0  ;;  %v507_v49 = vpack.c.bf16 %v233_v46, %v232_v56 }
  0x26   :  { %577 = vst [vmem:[%s966_s4 + $0x20] sm:$0xff] %v487_v42   ;;  %v239_v31 = vmax.f32 %v818_v50, 0.0  ;;  %v240_v32 = vmax.f32 %v825_v57, 0.0  ;;  %v241_v39 = vmax.f32 %v835_v5, 0.0  ;;  %v512_v52 = vpack.c.bf16 %v235_v3, %v234_v62 }
  0x27   :  { %578 = vst [vmem:[%s966_s4 + $0x28] sm:$0xff] %v492_v45   ;;  %v242_v40 = vmax.f32 %v843_v10, 0.0  ;;  %v243_v44 = vmax.f32 %v846_v11, 0.0  ;;  %v517_v53 = vpack.c.bf16 %v237_v13, %v236_v48  ;;  %v244_v50 = vmax.f32 %v853_v16, 0.0 }
  0x28   :  { %579 = vst [vmem:[%s966_s4 + $0x30] sm:$0xff] %v497_v61   ;;  %v245_v54 = vmax.f32 %v856_v17, 0.0  ;;  %v522_v57 = vpack.c.bf16 %v239_v31, %v238_v25  ;;  %v246_v58 = vmax.f32 %v862_v22, 0.0  ;;  %v247_v59 = vmax.f32 %v872_v28, 0.0 }
  0x29   :  { %580 = vst [vmem:[%s966_s4 + $0x38] sm:$0xff] %v502_v9   ;;  %v527_v60 = vpack.c.bf16 %v241_v39, %v240_v32  ;;  %v532_v63 = vpack.c.bf16 %v243_v44, %v242_v40 }
  0x2a   :  { %581 = vst [vmem:[%s966_s4 + $0x40] sm:$0xff] %v507_v49   ;;  %v537_v0 = vpack.c.bf16 %v245_v54, %v244_v50  ;;  %v542_v2 = vpack.c.bf16 %v247_v59, %v246_v58 }
  0x2b   :  { %582 = vst [vmem:[%s966_s4 + $0x48] sm:$0xff] %v512_v52  }
  0x2c   :  { %583 = vst [vmem:[%s966_s4 + $0x50] sm:$0xff] %v517_v53  }
  0x2d   :  { %584 = vst [vmem:[%s966_s4 + $0x58] sm:$0xff] %v522_v57  }
  0x2e   :  { %585 = vst [vmem:[%s966_s4 + $0x60] sm:$0xff] %v527_v60  }
  0x2f   :  { %586 = vst [vmem:[%s966_s4 + $0x68] sm:$0xff] %v532_v63  }
  0x30   :  { %587 = vst [vmem:[%s966_s4 + $0x70] sm:$0xff] %v537_v0  }
  0x31   :  { %588 = vst [vmem:[%s966_s4 + $0x78] sm:$0xff] %v542_v2  }

// kernel: _stem.3
= control target key start
LH: loop header
LB: loop body
LE: loop exit
PB: predicated region body
PF: predicated region fallthrough
CT: control target
= control target key end

     0   :  { %s1585_s12 = smov 0   ;;  %s1587_s13 = smov 0   ;;  %s1794_s0 = inlined_call_operand.vmem [shape: bf16[512,256], index: 0, kind: input, shape index: {}]   ;;  %s1795_s1 = inlined_call_operand.vmem [shape: bf16[256,128], index: 1, kind: input, shape index: {}]   ;;  %s1796_s2 = inlined_call_operand.vmem [shape: f32[1,128], index: 2, kind: input, shape index: {}]   ;;  %s1797_s3 = inlined_call_operand.vmem [shape: bf16[512,128], index: 3, kind: output, shape index: {}]  }
   0x1   :  { %s1589_s14 = smov 0  }
   0x2 LB: > { %s32_s15 = sadd.s32 1, %s1559_s13  ;;  %p1156_p0 = scmp.ge.s32.totalorder %s1563_s14, 1  ;;  %s1563_s14 = sphi %s1589_s14, %s13_s14   ;;  %s1559_s13 = sphi %s1587_s13, %s1799_s13   ;;  %s1555_s12 = sphi %s1585_s12, %s1798_s12  }
   0x3   : > { %p34_p1 = scmp.ge.s32.totalorder %s32_s15, 2  ;;  %p191_p2 = scmp.lt.s32.totalorder %s1563_s14, 3 }
   0x5   : > { %s1801_s15 = smov (%p34_p1, %s32_s15), 0  ;;  %p192_p3 = pnand %p1156_p0, %p191_p2 }
   0x6   : > { %s1157_s28 = sshll.u32 (!%p192_p3), %s1555_s12, 5 }
   0x7   : > { %195 = sbr.rel (%p192_p3) target bundleno = 304 (0x130), region = 32  ;;  %p236_p4 = scmp.lt.s32.totalorder (!%p192_p3), %s1157_s28, 63 }
   0xc   : > { %v1396_v0 = vld [vmem:[%s1795_s1 + $0x38] sm:$0xff]  ;;  %v1395_v2 = vld [vmem:[%s1795_s1 + $0x30] sm:$0xff]  ;;  %v1394_v4 = vld [vmem:[%s1795_s1 + $0x28] sm:$0xff]  ;;  %s1803_s28 = smov (!%p236_p4, %s1157_s28), 63 }
   0xd   : > { %v1404_v1 = vld [vmem:[%s1795_s1 + $0x78] sm:$0xff]  ;;  %587 = vmatpush.bf16.msra.mxu0 %v1396_v0  ;;  %1500 = vmatpush.bf16.msra.mxu2 %v1396_v0  ;;  %v1403_v3 = vld [vmem:[%s1795_s1 + $0x70] sm:$0xff]  ;;  %v1402_v5 = vld [vmem:[%s1795_s1 + $0x68] sm:$0xff]  ;;  %s1356_s17 = sshll.u32 %s1803_s28, 3  ;;  %s1161_s5 = sshll.u32 %s1803_s28, 2 }
   0xe   : > { %676 = vmatpush.bf16.msra.mxu1 %v1404_v1  ;;  %1508 = vmatpush.bf16.msra.mxu3 %v1404_v1  ;;  %v1393_v6 = vld [vmem:[%s1795_s1 + $0x20] sm:$0xff]  ;;  %v1392_v8 = vld [vmem:[%s1795_s1 + $0x18] sm:$0xff]  ;;  %v1391_v10 = vld [vmem:[%s1795_s1 + $0x10] sm:$0xff]  ;;  %s1651_s22 = scalar_lea.vmem %s1794_s0, %s1356_s17  ;;  %s1737_s8 = scalar_lea.vmem %s1797_s3, %s1161_s5 }
   0xf   : > { %v1401_v7 = vld [vmem:[%s1795_s1 + $0x60] sm:$0xff]  ;;  %v1400_v9 = vld [vmem:[%s1795_s1 + $0x58] sm:$0xff]  ;;  %v1399_v11 = vld [vmem:[%s1795_s1 + $0x50] sm:$0xff] }
  0x10   : > { %v1390_v12 = vld [vmem:[%s1795_s1 + $0x8] sm:$0xff]  ;;  %v1389_v14 = vld [vmem:[%s1795_s1] sm:$0xff]  ;;  %v1172_v28 = vld [vmem:[%s1651_s22 + $0x10] sm:$0xf] }
  0x11   : > { %588 = vmatpush.bf16.msra.mxu0 %v1395_v2  ;;  %1501 = vmatpush.bf16.msra.mxu2 %v1395_v2  ;;  %v1398_v13 = vld [vmem:[%s1795_s1 + $0x48] sm:$0xff]  ;;  %v1397_v15 = vld [vmem:[%s1795_s1 + $0x40] sm:$0xff]  ;;  %v1360_v29 = vld [vmem:[%s1651_s22 + $0x14] sm:$0xf0] }
  0x12   : > { %677 = vmatpush.bf16.msra.mxu1 %v1403_v3  ;;  %1509 = vmatpush.bf16.msra.mxu3 %v1403_v3  ;;  %v1164_v16 = vld [vmem:[%s1651_s22] sm:$0xf]  ;;  %v1358_v17 = vld [vmem:[%s1651_s22 + $0x4] sm:$0xf0]  ;;  %v1357_v20 = vld [vmem:[%s1651_s22 + $0x4] sm:$0xf]  ;;  %v1173_v36 = vor.u32 %v1360_v29, %v1172_v28 }
  0x13   : > { %v1228_v18 = vld [vmem:[%s1651_s22 + $0x80] sm:$0xf]  ;;  %v1374_v19 = vld [vmem:[%s1651_s22 + $0x84] sm:$0xf0]  ;;  %v1166_v21 = vld [vmem:[%s1651_s22 + $0x8] sm:$0xf0]  ;;  %v1165_v24 = vor.u32 %v1358_v17, %v1164_v16 }
  0x14   : > { %v1373_v22 = vld [vmem:[%s1651_s22 + $0x84] sm:$0xf]  ;;  %v1230_v23 = vld [vmem:[%s1651_s22 + $0x88] sm:$0xf0]  ;;  %v1229_v25 = vor.u32 %v1374_v19, %v1228_v18  ;;  %v1169_v26 = vor.u32 %v1357_v20, %v1166_v21  ;;  %v1236_v30 = vld [vmem:[%s1651_s22 + $0x90] sm:$0xf] }
  0x15   : > { %589 = vmatpush.bf16.msra.mxu0 %v1394_v4  ;;  %1502 = vmatpush.bf16.msra.mxu2 %v1394_v4  ;;  %v1233_v27 = vor.u32 %v1373_v22, %v1230_v23  ;;  %v1376_v31 = vld [vmem:[%s1651_s22 + $0x94] sm:$0xf0]  ;;  %v1359_v32 = vld [vmem:[%s1651_s22 + $0x14] sm:$0xf]  ;;  %v1174_v33 = vld [vmem:[%s1651_s22 + $0x18] sm:$0xf0] }
  0x16   : > { %678 = vmatpush.bf16.msra.mxu1 %v1402_v5  ;;  %1510 = vmatpush.bf16.msra.mxu3 %v1402_v5  ;;  %v1375_v34 = vld [vmem:[%s1651_s22 + $0x94] sm:$0xf]  ;;  %v1238_v35 = vld [vmem:[%s1651_s22 + $0x98] sm:$0xf0]  ;;  %v1237_v37 = vor.u32 %v1376_v31, %v1236_v30  ;;  %v1177_v38 = vor.u32 %v1359_v32, %v1174_v33  ;;  %v1180_v40 = vld [vmem:[%s1651_s22 + $0x20] sm:$0xf] }
  0x17   : > { %v1241_v39 = vor.u32 %v1375_v34, %v1238_v35  ;;  %v1362_v41 = vld [vmem:[%s1651_s22 + $0x24] sm:$0xf0]  ;;  %v1244_v42 = vld [vmem:[%s1651_s22 + $0xa0] sm:$0xf]  ;;  %v1361_v44 = vld [vmem:[%s1651_s22 + $0x24] sm:$0xf] }
  0x18   : > { %v1378_v43 = vld [vmem:[%s1651_s22 + $0xa4] sm:$0xf0]  ;;  %v1182_v45 = vld [vmem:[%s1651_s22 + $0x28] sm:$0xf0]  ;;  %v1377_v46 = vld [vmem:[%s1651_s22 + $0xa4] sm:$0xf]  ;;  %v1181_v48 = vor.u32 %v1362_v41, %v1180_v40 }
  0x19   : > { %590 = vmatpush.bf16.msra.mxu0 %v1393_v6  ;;  %1503 = vmatpush.bf16.msra.mxu2 %v1393_v6  ;;  %v1246_v47 = vld [vmem:[%s1651_s22 + $0xa8] sm:$0xf0]  ;;  %v1245_v49 = vor.u32 %v1378_v43, %v1244_v42  ;;  %v1185_v50 = vor.u32 %v1361_v44, %v1182_v45  ;;  %v1188_v52 = vld [vmem:[%s1651_s22 + $0x30] sm:$0xf]  ;;  %v1364_v53 = vld [vmem:[%s1651_s22 + $0x34] sm:$0xf0] }
  0x1a   : > { %679 = vmatpush.bf16.msra.mxu1 %v1401_v7  ;;  %1511 = vmatpush.bf16.msra.mxu3 %v1401_v7  ;;  %v1249_v51 = vor.u32 %v1377_v46, %v1246_v47  ;;  %v1252_v54 = vld [vmem:[%s1651_s22 + $0xb0] sm:$0xf]  ;;  %v1380_v55 = vld [vmem:[%s1651_s22 + $0xb4] sm:$0xf0]  ;;  %v1363_v56 = vld [vmem:[%s1651_s22 + $0x34] sm:$0xf]  ;;  %v1189_v60 = vor.u32 %v1364_v53, %v1188_v52 }
  0x1b   : > { %v1190_v57 = vld [vmem:[%s1651_s22 + $0x38] sm:$0xf0]  ;;  %v1379_v58 = vld [vmem:[%s1651_s22 + $0xb4] sm:$0xf]  ;;  %v1253_v61 = vor.u32 %v1380_v55, %v1252_v54  ;;  %v1196_v0 = vld [vmem:[%s1651_s22 + $0x40] sm:$0xf] }
  0x1c   : > { %v1254_v59 = vld [vmem:[%s1651_s22 + $0xb8] sm:$0xf0]  ;;  %v1193_v62 = vor.u32 %v1363_v56, %v1190_v57  ;;  %v1366_v1 = vld [vmem:[%s1651_s22 + $0x44] sm:$0xf0]  ;;  %v1260_v2 = vld [vmem:[%s1651_s22 + $0xc0] sm:$0xf] }
  0x1d   : > { %591 = vmatpush.bf16.msra.mxu0 %v1392_v8  ;;  %1504 = vmatpush.bf16.msra.mxu2 %v1392_v8  ;;  %v1257_v63 = vor.u32 %v1379_v58, %v1254_v59  ;;  %v1382_v3 = vld [vmem:[%s1651_s22 + $0xc4] sm:$0xf0]  ;;  %v1365_v4 = vld [vmem:[%s1651_s22 + $0x44] sm:$0xf]  ;;  %v1198_v5 = vld [vmem:[%s1651_s22 + $0x48] sm:$0xf0]  ;;  %v1197_v8 = vor.u32 %v1366_v1, %v1196_v0 }
  0x1e   : > { %680 = vmatpush.bf16.msra.mxu1 %v1400_v9  ;;  %1512 = vmatpush.bf16.msra.mxu3 %v1400_v9  ;;  %v1381_v6 = vld [vmem:[%s1651_s22 + $0xc4] sm:$0xf]  ;;  %v1262_v7 = vld [vmem:[%s1651_s22 + $0xc8] sm:$0xf0]  ;;  %v1261_v9 = vor.u32 %v1382_v3, %v1260_v2  ;;  %v1367_v16 = vld [vmem:[%s1651_s22 + $0x54] sm:$0xf] }
  0x1f   : > { %v1206_v17 = vld [vmem:[%s1651_s22 + $0x58] sm:$0xf0]  ;;  %v1383_v18 = vld [vmem:[%s1651_s22 + $0xd4] sm:$0xf]  ;;  %v1369_v28 = vld [vmem:[%s1651_s22 + $0x64] sm:$0xf] }
  0x20   : > { %v1270_v19 = vld [vmem:[%s1651_s22 + $0xd8] sm:$0xf0]  ;;  %v1209_v22 = vor.u32 %v1367_v16, %v1206_v17  ;;  %v1214_v29 = vld [vmem:[%s1651_s22 + $0x68] sm:$0xf0]  ;;  %v1385_v30 = vld [vmem:[%s1651_s22 + $0xe4] sm:$0xf] }
  0x21   : > { %592 = vmatpush.bf16.msra.mxu0 %v1391_v10  ;;  %1505 = vmatpush.bf16.msra.mxu2 %v1391_v10  ;;  %v1201_v10 = vor.u32 %v1365_v4, %v1198_v5  ;;  %v1273_v23 = vor.u32 %v1383_v18, %v1270_v19  ;;  %v1278_v31 = vld [vmem:[%s1651_s22 + $0xe8] sm:$0xf0]  ;;  %v1217_v34 = vor.u32 %v1369_v28, %v1214_v29  ;;  %v1371_v40 = vld [vmem:[%s1651_s22 + $0x74] sm:$0xf]  ;;  %v1222_v41 = vld [vmem:[%s1651_s22 + $0x78] sm:$0xf0] }
  0x22   : > { %681 = vmatpush.bf16.msra.mxu1 %v1399_v11  ;;  %1513 = vmatpush.bf16.msra.mxu3 %v1399_v11  ;;  %v1265_v11 = vor.u32 %v1381_v6, %v1262_v7  ;;  %v1281_v35 = vor.u32 %v1385_v30, %v1278_v31  ;;  %v1387_v42 = vld [vmem:[%s1651_s22 + $0xf4] sm:$0xf]  ;;  %v1286_v43 = vld [vmem:[%s1651_s22 + $0xf8] sm:$0xf0]  ;;  %v1225_v46 = vor.u32 %v1371_v40, %v1222_v41  ;;  %v1729_v53 = vld [vmem:[%s1796_s2] ss:$0 sm:$0xff] }
  0x23   : > { %v1289_v47 = vor.u32 %v1387_v42, %v1286_v43 }
  0x25   : > { %593 = vmatpush.bf16.msra.mxu0 %v1390_v12  ;;  %1506 = vmatpush.bf16.msra.mxu2 %v1390_v12  ;;  %v1204_v12 = vld [vmem:[%s1651_s22 + $0x50] sm:$0xf] }
  0x26   : > { %682 = vmatpush.bf16.msra.mxu1 %v1398_v13  ;;  %1514 = vmatpush.bf16.msra.mxu3 %v1398_v13  ;;  %v1368_v13 = vld [vmem:[%s1651_s22 + $0x54] sm:$0xf0] }
  0x27   : > { %v1205_v20 = vor.u32 %v1368_v13, %v1204_v12 }
  0x29   : > { %594 = vmatpush.bf16.msra.mxu0 %v1389_v14  ;;  %1507 = vmatpush.bf16.msra.mxu2 %v1389_v14  ;;  %v1268_v14 = vld [vmem:[%s1651_s22 + $0xd0] sm:$0xf] }
  0x2a   : > { %683 = vmatpush.bf16.msra.mxu1 %v1397_v15  ;;  %1515 = vmatpush.bf16.msra.mxu3 %v1397_v15  ;;  %v1384_v15 = vld [vmem:[%s1651_s22 + $0xd4] sm:$0xf0] }
  0x2b   : > { %v1269_v21 = vor.u32 %v1384_v15, %v1268_v14 }
  0x2c   : > { %595 = vmatmul.bf16.vlgmr.msra.gmra.mxu0 %v1165_v24  ;;  %635 = vmatmul.bf16.vlgmr.msra.gmra.mxu2 %v1229_v25  ;;  %v1212_v24 = vld [vmem:[%s1651_s22 + $0x60] sm:$0xf]  ;;  %v1370_v25 = vld [vmem:[%s1651_s22 + $0x64] sm:$0xf0] }
  0x2d   : > { %684 = vmatmul.bf16.vlgmr.msra.gmra.mxu1 %v1169_v26  ;;  %724 = vmatmul.bf16.vlgmr.msra.gmra.mxu3 %v1233_v27  ;;  %v1276_v26 = vld [vmem:[%s1651_s22 + $0xe0] sm:$0xf]  ;;  %v1386_v27 = vld [vmem:[%s1651_s22 + $0xe4] sm:$0xf0]  ;;  %v1213_v32 = vor.u32 %v1370_v25, %v1212_v24 }
  0x2e   : > { %v1277_v33 = vor.u32 %v1386_v27, %v1276_v26 }
  0x3c   : > { %600 = vmatmul.bf16.gmra.mxu0 %v1173_v36  ;;  %640 = vmatmul.bf16.gmra.mxu2 %v1237_v37  ;;  %v1220_v36 = vld [vmem:[%s1651_s22 + $0x70] sm:$0xf]  ;;  %v1372_v37 = vld [vmem:[%s1651_s22 + $0x74] sm:$0xf0] }
  0x3d   : > { %689 = vmatmul.bf16.gmra.mxu1 %v1177_v38  ;;  %729 = vmatmul.bf16.gmra.mxu3 %v1241_v39  ;;  %v1284_v38 = vld [vmem:[%s1651_s22 + $0xf0] sm:$0xf]  ;;  %v1388_v39 = vld [vmem:[%s1651_s22 + $0xf4] sm:$0xf0]  ;;  %v1221_v44 = vor.u32 %v1372_v37, %v1220_v36 }
  0x3e   : > { %v1285_v45 = vor.u32 %v1388_v39, %v1284_v38 }
  0x4c   : > { %605 = vmatmul.bf16.gmra.mxu0 %v1181_v48  ;;  %645 = vmatmul.bf16.gmra.mxu2 %v1245_v49 }
  0x4d   : > { %694 = vmatmul.bf16.gmra.mxu1 %v1185_v50  ;;  %734 = vmatmul.bf16.gmra.mxu3 %v1249_v51 }
  0x5c   : > { %610 = vmatmul.bf16.gmra.mxu0 %v1189_v60  ;;  %650 = vmatmul.bf16.gmra.mxu2 %v1253_v61 }
  0x5d   : > { %699 = vmatmul.bf16.gmra.mxu1 %v1193_v62  ;;  %739 = vmatmul.bf16.gmra.mxu3 %v1257_v63 }
  0x6c   : > { %615 = vmatmul.bf16.gmra.mxu0 %v1197_v8  ;;  %655 = vmatmul.bf16.gmra.mxu2 %v1261_v9 }
  0x6d   : > { %704 = vmatmul.bf16.gmra.mxu1 %v1201_v10  ;;  %744 = vmatmul.bf16.gmra.mxu3 %v1265_v11 }
  0x7c   : > { %620 = vmatmul.bf16.gmra.mxu0 %v1205_v20  ;;  %660 = vmatmul.bf16.gmra.mxu2 %v1269_v21 }
  0x7d   : > { %709 = vmatmul.bf16.gmra.mxu1 %v1209_v22  ;;  %749 = vmatmul.bf16.gmra.mxu3 %v1273_v23 }
  0x8c   : > { %625 = vmatmul.bf16.gmra.mxu0 %v1213_v32  ;;  %665 = vmatmul.bf16.gmra.mxu2 %v1277_v33 }
  0x8d   : > { %714 = vmatmul.bf16.gmra.mxu1 %v1217_v34  ;;  %754 = vmatmul.bf16.gmra.mxu3 %v1281_v35 }
  0x9c   : > { %630 = vmatmul.bf16.gmra.mxu0 %v1221_v44  ;;  %670 = vmatmul.bf16.gmra.mxu2 %v1285_v45 }
  0x9d   : > { %719 = vmatmul.bf16.gmra.mxu1 %v1225_v46  ;;  %759 = vmatmul.bf16.gmra.mxu3 %v1289_v47 }
  0xa9   : > { %v596_v48 = vpop.f32.mrf.mxu0 }
  0xaa   : > { %v685_v49 = vpop.f32.mrf.mxu1 }
  0xab   : > { %v686_v52 = vadd.f32 %v685_v49, %v596_v48 }
  0xad   : > { %v940_v57 = vadd.f32 %v1729_v53, %v686_v52 }
  0xaf   : > { %v636_v50 = vpop.f32.mrf.mxu2 }
  0xb0   : > { %v725_v51 = vpop.f32.mrf.mxu3 }
  0xb1   : > { %v598_v54 = vpop.f32.mrf.mxu0  ;;  %v726_v59 = vadd.f32 %v725_v51, %v636_v50 }
  0xb2   : > { %v687_v55 = vpop.f32.mrf.mxu1 }
  0xb3   : > { %v688_v56 = vadd.f32 %v687_v55, %v598_v54  ;;  %v956_v2 = vadd.f32 %v1729_v53, %v726_v59 }
  0xb5   : > { %v941_v58 = vadd.f32 %v1729_v53, %v688_v56 }
  0xb7   : > { %v1408_v60 = vpack.c.bf16 %v941_v58, %v940_v57  ;;  %v638_v61 = vpop.f32.mrf.mxu2 }
  0xb8   : > { %v727_v62 = vpop.f32.mrf.mxu3 }
  0xb9   : > { %1409 = vst [vmem:[%s1737_s8] sm:$0xff] %v1408_v60   ;;  %v728_v63 = vadd.f32 %v727_v62, %v638_v61  ;;  %v601_v0 = vpop.f32.mrf.mxu0 }
  0xba   : > { %v690_v1 = vpop.f32.mrf.mxu1 }
  0xbb   : > { %v957_v3 = vadd.f32 %v1729_v53, %v728_v63  ;;  %v691_v7 = vadd.f32 %v690_v1, %v601_v0 }
  0xbd   : > { %v1448_v4 = vpack.c.bf16 %v957_v3, %v956_v2  ;;  %v942_v11 = vadd.f32 %v1729_v53, %v691_v7 }
  0xbf   : > { %1492 = vst [vmem:[%s1737_s8 + $0x40] sm:$0xff] %v1448_v4   ;;  %v641_v5 = vpop.f32.mrf.mxu2 }
  0xc0   : > { %v730_v6 = vpop.f32.mrf.mxu3 }
  0xc1   : > { %v603_v8 = vpop.f32.mrf.mxu0  ;;  %v731_v13 = vadd.f32 %v730_v6, %v641_v5 }
  0xc2   : > { %v692_v9 = vpop.f32.mrf.mxu1 }
  0xc3   : > { %v693_v10 = vadd.f32 %v692_v9, %v603_v8  ;;  %v958_v20 = vadd.f32 %v1729_v53, %v731_v13 }
  0xc5   : > { %v943_v12 = vadd.f32 %v1729_v53, %v693_v10 }
  0xc7   : > { %v1413_v14 = vpack.c.bf16 %v943_v12, %v942_v11  ;;  %v643_v15 = vpop.f32.mrf.mxu2 }
  0xc8   : > { %v732_v16 = vpop.f32.mrf.mxu3 }
  0xc9   : > { %1485 = vst [vmem:[%s1737_s8 + $0x8] sm:$0xff] %v1413_v14   ;;  %v733_v17 = vadd.f32 %v732_v16, %v643_v15  ;;  %v606_v18 = vpop.f32.mrf.mxu0 }
  0xca   : > { %v695_v19 = vpop.f32.mrf.mxu1 }
  0xcb   : > { %v959_v21 = vadd.f32 %v1729_v53, %v733_v17  ;;  %v696_v25 = vadd.f32 %v695_v19, %v606_v18 }
  0xcd   : > { %v1453_v22 = vpack.c.bf16 %v959_v21, %v958_v20  ;;  %v944_v29 = vadd.f32 %v1729_v53, %v696_v25 }
  0xcf   : > { %1493 = vst [vmem:[%s1737_s8 + $0x48] sm:$0xff] %v1453_v22   ;;  %v646_v23 = vpop.f32.mrf.mxu2 }
  0xd0   : > { %v735_v24 = vpop.f32.mrf.mxu3 }
  0xd1   : > { %v608_v26 = vpop.f32.mrf.mxu0  ;;  %v736_v31 = vadd.f32 %v735_v24, %v646_v23 }
  0xd2   : > { %v697_v27 = vpop.f32.mrf.mxu1 }
  0xd3   : > { %v698_v28 = vadd.f32 %v697_v27, %v608_v26  ;;  %v960_v38 = vadd.f32 %v1729_v53, %v736_v31 }
  0xd5   : > { %v945_v30 = vadd.f32 %v1729_v53, %v698_v28 }
  0xd7   : > { %v1418_v32 = vpack.c.bf16 %v945_v30, %v944_v29  ;;  %v648_v33 = vpop.f32.mrf.mxu2 }
  0xd8   : > { %v737_v34 = vpop.f32.mrf.mxu3 }
  0xd9   : > { %1486 = vst [vmem:[%s1737_s8 + $0x10] sm:$0xff] %v1418_v32   ;;  %v738_v35 = vadd.f32 %v737_v34, %v648_v33  ;;  %v611_v36 = vpop.f32.mrf.mxu0 }
  0xda   : > { %v700_v37 = vpop.f32.mrf.mxu1 }
  0xdb   : > { %v961_v39 = vadd.f32 %v1729_v53, %v738_v35  ;;  %v701_v43 = vadd.f32 %v700_v37, %v611_v36 }
  0xdd   : > { %v1458_v40 = vpack.c.bf16 %v961_v39, %v960_v38  ;;  %v946_v47 = vadd.f32 %v1729_v53, %v701_v43 }
  0xdf   : > { %1494 = vst [vmem:[%s1737_s8 + $0x50] sm:$0xff] %v1458_v40   ;;  %v651_v41 = vpop.f32.mrf.mxu2 }
  0xe0   : > { %v740_v42 = vpop.f32.mrf.mxu3 }
  0xe1   : > { %v613_v44 = vpop.f32.mrf.mxu0  ;;  %v741_v49 = vadd.f32 %v740_v42, %v651_v41 }
  0xe2   : > { %v702_v45 = vpop.f32.mrf.mxu1 }
  0xe3   : > { %v703_v46 = vadd.f32 %v702_v45, %v613_v44  ;;  %v962_v57 = vadd.f32 %v1729_v53, %v741_v49 }
  0xe5   : > { %v947_v48 = vadd.f32 %v1729_v53, %v703_v46 }
  0xe7   : > { %v1423_v50 = vpack.c.bf16 %v947_v48, %v946_v47  ;;  %v653_v51 = vpop.f32.mrf.mxu2 }
  0xe8   : > { %v742_v52 = vpop.f32.mrf.mxu3 }
  0xe9   : > { %1487 = vst [vmem:[%s1737_s8 + $0x18] sm:$0xff] %v1423_v50   ;;  %v743_v54 = vadd.f32 %v742_v52, %v653_v51  ;;  %v616_v55 = vpop.f32.mrf.mxu0 }
  0xea   : > { %v705_v56 = vpop.f32.mrf.mxu1 }
  0xeb   : > { %v963_v58 = vadd.f32 %v1729_v53, %v743_v54  ;;  %v706_v62 = vadd.f32 %v705_v56, %v616_v55 }
  0xed   : > { %v1463_v59 = vpack.c.bf16 %v963_v58, %v962_v57  ;;  %v948_v2 = vadd.f32 %v1729_v53, %v706_v62 }
  0xef   : > { %1495 = vst [vmem:[%s1737_s8 + $0x58] sm:$0xff] %v1463_v59   ;;  %v656_v60 = vpop.f32.mrf.mxu2 }
  0xf0   : > { %v745_v61 = vpop.f32.mrf.mxu3 }
  0xf1   : > { %v618_v63 = vpop.f32.mrf.mxu0  ;;  %v746_v4 = vadd.f32 %v745_v61, %v656_v60 }
  0xf2   : > { %v707_v0 = vpop.f32.mrf.mxu1 }
  0xf3   : > { %v708_v1 = vadd.f32 %v707_v0, %v618_v63  ;;  %v964_v11 = vadd.f32 %v1729_v53, %v746_v4 }
  0xf5   : > { %v949_v3 = vadd.f32 %v1729_v53, %v708_v1 }
  0xf7   : > { %v1428_v5 = vpack.c.bf16 %v949_v3, %v948_v2  ;;  %v658_v6 = vpop.f32.mrf.mxu2 }
  0xf8   : > { %v747_v7 = vpop.f32.mrf.mxu3 }
  0xf9   : > { %1488 = vst [vmem:[%s1737_s8 + $0x20] sm:$0xff] %v1428_v5   ;;  %v748_v8 = vadd.f32 %v747_v7, %v658_v6  ;;  %v621_v9 = vpop.f32.mrf.mxu0 }
  0xfa   : > { %v710_v10 = vpop.f32.mrf.mxu1 }
  0xfb   : > { %v965_v12 = vadd.f32 %v1729_v53, %v748_v8  ;;  %v711_v16 = vadd.f32 %v710_v10, %v621_v9 }
  0xfd   : > { %v1468_v13 = vpack.c.bf16 %v965_v12, %v964_v11  ;;  %v950_v20 = vadd.f32 %v1729_v53, %v711_v16 }
  0xff   : > { %1496 = vst [vmem:[%s1737_s8 + $0x60] sm:$0xff] %v1468_v13   ;;  %v661_v14 = vpop.f32.mrf.mxu2 }
 0x100   : > { %v750_v15 = vpop.f32.mrf.mxu3 }
 0x101   : > { %v623_v17 = vpop.f32.mrf.mxu0  ;;  %v751_v22 = vadd.f32 %v750_v15, %v661_v14 }
 0x102   : > { %v712_v18 = vpop.f32.mrf.mxu1 }
 0x103   : > { %v713_v19 = vadd.f32 %v712_v18, %v623_v17  ;;  %v966_v29 = vadd.f32 %v1729_v53, %v751_v22 }
 0x105   : > { %v951_v21 = vadd.f32 %v1729_v53, %v713_v19 }
 0x107   : > { %v1433_v23 = vpack.c.bf16 %v951_v21, %v950_v20  ;;  %v663_v24 = vpop.f32.mrf.mxu2 }
 0x108   : > { %v752_v25 = vpop.f32.mrf.mxu3 }
 0x109   : > { %1489 = vst [vmem:[%s1737_s8 + $0x28] sm:$0xff] %v1433_v23   ;;  %v753_v26 = vadd.f32 %v752_v25, %v663_v24  ;;  %v626_v27 = vpop.f32.mrf.mxu0 }
 0x10a   : > { %v715_v28 = vpop.f32.mrf.mxu1 }
 0x10b   : > { %v967_v30 = vadd.f32 %v1729_v53, %v753_v26  ;;  %v716_v34 = vadd.f32 %v715_v28, %v626_v27 }
 0x10d   : > { %v1473_v31 = vpack.c.bf16 %v967_v30, %v966_v29  ;;  %v952_v38 = vadd.f32 %v1729_v53, %v716_v34 }
 0x10f   : > { %1497 = vst [vmem:[%s1737_s8 + $0x68] sm:$0xff] %v1473_v31   ;;  %v666_v32 = vpop.f32.mrf.mxu2 }
 0x110   : > { %v755_v33 = vpop.f32.mrf.mxu3 }
 0x111   : > { %v628_v35 = vpop.f32.mrf.mxu0  ;;  %v756_v40 = vadd.f32 %v755_v33, %v666_v32 }
 0x112   : > { %v717_v36 = vpop.f32.mrf.mxu1 }
 0x113   : > { %v718_v37 = vadd.f32 %v717_v36, %v628_v35  ;;  %v968_v47 = vadd.f32 %v1729_v53, %v756_v40 }
 0x115   : > { %v953_v39 = vadd.f32 %v1729_v53, %v718_v37 }
 0x117   : > { %v1438_v41 = vpack.c.bf16 %v953_v39, %v952_v38  ;;  %v668_v42 = vpop.f32.mrf.mxu2 }
 0x118   : > { %v757_v43 = vpop.f32.mrf.mxu3 }
 0x119   : > { %1490 = vst [vmem:[%s1737_s8 + $0x30] sm:$0xff] %v1438_v41   ;;  %v758_v44 = vadd.f32 %v757_v43, %v668_v42  ;;  %v631_v45 = vpop.f32.mrf.mxu0 }
 0x11a   : > { %v720_v46 = vpop.f32.mrf.mxu1 }
 0x11b   : > { %v969_v48 = vadd.f32 %v1729_v53, %v758_v44  ;;  %v721_v52 = vadd.f32 %v720_v46, %v631_v45 }
 0x11d   : > { %v1478_v49 = vpack.c.bf16 %v969_v48, %v968_v47  ;;  %v954_v57 = vadd.f32 %v1729_v53, %v721_v52 }
 0x11f   : > { %1498 = vst [vmem:[%s1737_s8 + $0x70] sm:$0xff] %v1478_v49   ;;  %v671_v50 = vpop.f32.mrf.mxu2 }
 0x120   : > { %v760_v51 = vpop.f32.mrf.mxu3 }
 0x121   : > { %v633_v54 = vpop.f32.mrf.mxu0  ;;  %v761_v59 = vadd.f32 %v760_v51, %v671_v50 }
 0x122   : > { %v722_v55 = vpop.f32.mrf.mxu1 }
 0x123   : > { %v723_v56 = vadd.f32 %v722_v55, %v633_v54  ;;  %v970_v0 = vadd.f32 %v1729_v53, %v761_v59 }
 0x125   : > { %v955_v58 = vadd.f32 %v1729_v53, %v723_v56 }
 0x127   : > { %v1443_v60 = vpack.c.bf16 %v955_v58, %v954_v57  ;;  %v673_v61 = vpop.f32.mrf.mxu2 }
 0x128   : > { %v762_v62 = vpop.f32.mrf.mxu3 }
 0x129   : > { %1491 = vst [vmem:[%s1737_s8 + $0x38] sm:$0xff] %v1443_v60   ;;  %v763_v63 = vadd.f32 %v762_v62, %v673_v61 }
 0x12b   : > { %v971_v1 = vadd.f32 %v1729_v53, %v763_v63 }
 0x12d   : > { %v1483_v2 = vpack.c.bf16 %v971_v1, %v970_v0 }
 0x12f   : > { %1499 = vst [vmem:[%s1737_s8 + $0x78] sm:$0xff] %v1483_v2  }
 0x130 PF: > { %s13_s14 = sadd.s32 1, %s1563_s14   ;;  %s1798_s12 = smov %s1559_s13 }
 0x131   : > { %p10_p5 = scmp.ge.s32.totalorder %s13_s14, 4   ;;  %s1799_s13 = smov %s1801_s15 }
 0x133   :  { %12 = sbr.rel (!%p10_p5) target bundleno = 2 (0x2), region = 80 }

// kernel: _stem.5
= control target key start
LH: loop header
LB: loop body
LE: loop exit
PB: predicated region body
PF: predicated region fallthrough
CT: control target
= control target key end

     0   :  { %s262_s0 = inlined_call_operand.vmem [shape: bf16[64,128], index: 0, kind: input, shape index: {}]   ;;  %s263_s1 = inlined_call_operand.vmem [shape: bf16[64,128], index: 1, kind: input, shape index: {}]   ;;  %s264_s2 = inlined_call_operand.vmem [shape: bf16[64,128], index: 2, kind: input, shape index: {}]   ;;  %s265_s3 = inlined_call_operand.vmem [shape: bf16[64,128], index: 3, kind: output, shape index: {}]  }
   0x1   :  { %v115_v0 = vld [vmem:[%s262_s0] sm:$0xff]   ;;  %v182_v7 = vld [vmem:[%s262_s0 + $0x8] sm:$0xff]   ;;  %v183_v14 = vld [vmem:[%s262_s0 + $0x10] sm:$0xff]  }
   0x2   :  { %v131_v1 = vld [vmem:[%s263_s1] sm:$0xff]   ;;  %v116_v3 = vunpack.c.l.bf16 %v115_v0  ;;  %v117_v4 = vunpack.c.h.bf16 %v115_v0  ;;  %v185_v8 = vld [vmem:[%s263_s1 + $0x8] sm:$0xff]   ;;  %v120_v12 = vunpack.c.l.bf16 %v182_v7  ;;  %v121_v13 = vunpack.c.h.bf16 %v182_v7  ;;  %v186_v19 = vld [vmem:[%s263_s1 + $0x10] sm:$0xff]  }
   0x3   :  { %v147_v2 = vld [vmem:[%s264_s2] sm:$0xff]   ;;  %v132_v5 = vunpack.c.l.bf16 %v131_v1  ;;  %v133_v6 = vunpack.c.h.bf16 %v131_v1  ;;  %v188_v9 = vld [vmem:[%s264_s2 + $0x8] sm:$0xff]   ;;  %v136_v17 = vunpack.c.l.bf16 %v185_v8  ;;  %v137_v18 = vunpack.c.h.bf16 %v185_v8  ;;  %v189_v20 = vld [vmem:[%s264_s2 + $0x10] sm:$0xff]  }
   0x4   :  { %v148_v10 = vunpack.c.l.bf16 %v147_v2  ;;  %v149_v11 = vunpack.c.h.bf16 %v147_v2  ;;  %v152_v21 = vunpack.c.l.bf16 %v188_v9  ;;  %v153_v22 = vunpack.c.h.bf16 %v188_v9  ;;  %v184_v25 = vld [vmem:[%s262_s0 + $0x18] sm:$0xff]  }
   0x5   :  { %v46_v15 = vmax.f32 %v116_v3, %v132_v5  ;;  %v47_v16 = vmax.f32 %v117_v4, %v133_v6  ;;  %v124_v23 = vunpack.c.l.bf16 %v183_v14  ;;  %v125_v24 = vunpack.c.h.bf16 %v183_v14  ;;  %v187_v30 = vld [vmem:[%s263_s1 + $0x18] sm:$0xff]  }
   0x6   :  { %v48_v28 = vmax.f32 %v120_v12, %v136_v17  ;;  %v49_v29 = vmax.f32 %v121_v13, %v137_v18  ;;  %v140_v31 = vunpack.c.l.bf16 %v186_v19  ;;  %v141_v32 = vunpack.c.h.bf16 %v186_v19  ;;  %v190_v35 = vld [vmem:[%s264_s2 + $0x18] sm:$0xff]  }
   0x7   :  { %v86_v26 = vmax.f32 %v46_v15, %v148_v10  ;;  %v87_v27 = vmax.f32 %v47_v16, %v149_v11  ;;  %v156_v33 = vunpack.c.l.bf16 %v189_v20  ;;  %v157_v34 = vunpack.c.h.bf16 %v189_v20 }
   0x8   :  { %v88_v37 = vmax.f32 %v48_v28, %v152_v21  ;;  %v89_v38 = vmax.f32 %v49_v29, %v153_v22  ;;  %v128_v39 = vunpack.c.l.bf16 %v184_v25  ;;  %v50_v40 = vmax.f32 %v124_v23, %v140_v31 }
   0x9   :  { %v165_v36 = vpack.c.bf16 %v87_v27, %v86_v26  ;;  %v51_v41 = vmax.f32 %v125_v24, %v141_v32  ;;  %v129_v42 = vunpack.c.h.bf16 %v184_v25  ;;  %v144_v43 = vunpack.c.l.bf16 %v187_v30 }
   0xa   :  { %v170_v44 = vpack.c.bf16 %v89_v38, %v88_v37  ;;  %v145_v45 = vunpack.c.h.bf16 %v187_v30  ;;  %v160_v46 = vunpack.c.l.bf16 %v190_v35  ;;  %v161_v47 = vunpack.c.h.bf16 %v190_v35 }
   0xb   :  { %166 = vst [vmem:[%s265_s3] sm:$0xff] %v165_v36   ;;  %v90_v48 = vmax.f32 %v50_v40, %v156_v33  ;;  %v91_v49 = vmax.f32 %v51_v41, %v157_v34  ;;  %v52_v50 = vmax.f32 %v128_v39, %v144_v43 }
   0xc   :  { %191 = vst [vmem:[%s265_s3 + $0x8] sm:$0xff] %v170_v44   ;;  %v53_v51 = vmax.f32 %v129_v42, %v145_v45 }
   0xd   :  { %v175_v52 = vpack.c.bf16 %v91_v49, %v90_v48  ;;  %v92_v53 = vmax.f32 %v52_v50, %v160_v46 }
   0xe   :  { %v93_v54 = vmax.f32 %v53_v51, %v161_v47 }
   0xf   :  { %192 = vst [vmem:[%s265_s3 + $0x10] sm:$0xff] %v175_v52  }
  0x10   :  { %v180_v55 = vpack.c.bf16 %v93_v54, %v92_v53 }
  0x12   :  { %193 = vst [vmem:[%s265_s3 + $0x18] sm:$0xff] %v180_v55  }

</bundles_post_ra>
